<compile_context>
chip_gen: v7x
topology: tpu7x:2x2x1
jax: 0.10.0
libtpu: 0.0.40
codegen_flags: <defaults>
</compile_context>

<pallas_src>
import functools

import jax
import jax.numpy as jnp
from jax.experimental import pallas as pl
from jax.experimental.pallas import tpu as pltpu

_NEG_BIG = -1e30
_LANE = 128
_SUBLANE = 8


def _round_up(v, m):
    return ((v + m - 1) // m) * m


def _vmem_limit_bytes():
    """Pick a scoped-VMEM limit safe for v5e/v6e (128 MiB) and v7x (64 MiB)."""
    try:
        cap = int(pltpu.get_tpu_info().vmem_capacity_bytes)
    except Exception:
        cap = 64 << 20
    return min(cap * 3 // 4, 100 << 20)


def _head_projection(att, cols):
    """[heads, C] per-head attention vectors -> block matrix [heads*C, cols].

    Column hd holds att[hd] in rows hd*C:(hd+1)*C, zeros elsewhere; extra columns
    (cols > heads) are zero padding."""
    heads, c = att.shape
    eye = jnp.eye(heads, cols, dtype=att.dtype)               # [heads, cols]
    return (att[:, :, None] * eye[:, None, :]).reshape(heads * c, cols)


def _gat_proj_kernel(x_ref, w_ref, asrct_ref, adst_ref,
                     h_ref, adst_out_ref, asrct_out_ref):
    """h = x @ W and batched per-head alpha projections (all bf16 MXU, f32 acc)."""
    h32 = jnp.dot(x_ref[...], w_ref[...], preferred_element_type=jnp.float32)
    hb = h32.astype(jnp.bfloat16)
    h_ref[...] = hb                                           # [N, pad128(H*C)]
    # alpha_dst[n, hd] = att_dst[hd] . h[n, hd*C:(hd+1)*C]        -> [N, 128]
    adst_out_ref[...] = jnp.dot(hb, adst_ref[...],
                                preferred_element_type=jnp.float32)
    # alpha_src^T[hd, n] = att_src[hd] . h[n, hd*C:(hd+1)*C]      -> [pad8(H), N]
    # (source-node axis lands on lanes so the attention kernel needs no transposes)
    asrct_out_ref[...] = jax.lax.dot_general(
        asrct_ref[...], hb, (((1,), (1,)), ((), ())),
        preferred_element_type=jnp.float32)


def _gat_attn_kernel(adst_ref, asrct_ref, h_ref, bias_ref, mask_ref, out_ref, *,
                     heads, out_channels, out_pad, apply_elu, apply_log_softmax):
    """Masked multi-head attention + aggregation for one row-tile of target nodes."""
    c = out_channels
    hc = heads * c
    # Head-invariant additive mask, loaded once per tile (precomputed host-side).
    mask_bias = mask_ref[...].astype(jnp.float32)                 # [TM, N]
    a_dst = adst_ref[...]                                         # [TM, 128] f32
    a_src = asrct_ref[...]                                        # [pad8(H), N] f32
    h = h_ref[...]                                                # [N, pad128(H*C)] bf16

    head_outs = []
    for hd in range(heads):
        # e[i, j] = LeakyReLU(alpha_dst[i] + alpha_src[j], slope=0.2)
        e = a_dst[:, hd:hd + 1] + a_src[hd:hd + 1, :]             # [TM, N]
        e = jnp.where(e > 0, e, 0.2 * e)
        e = e + mask_bias
        e = e - jnp.max(e, axis=1, keepdims=True)
        p = jnp.exp(e)           # masked entries underflow to exactly 0.0 in f32
        inv = pl.reciprocal(jnp.sum(p, axis=1, keepdims=True), approx=True)
        attn = (p * inv).astype(jnp.bfloat16)
        head_outs.append(jnp.dot(attn, h[:, hd * c:(hd + 1) * c],
                                 preferred_element_type=jnp.float32))  # [TM, C]

    y = head_outs[0] if heads == 1 else jnp.concatenate(head_outs, axis=1)
    y = y + bias_ref[...]                                         # bias [1, H*C]

    if apply_elu:                                                 # F.elu, alpha=1.0
        y = jnp.where(y > 0, y, jnp.exp(y) - 1.0)
    if apply_log_softmax:                                         # log_softmax(dim=1)
        m = jnp.max(y, axis=1, keepdims=True)
        z = y - m
        y = z - jnp.log(jnp.sum(jnp.exp(z), axis=1, keepdims=True))

    if out_pad > hc:   # lane-dense (multiple-of-128) store; wrapper trims padding
        y = jnp.concatenate(
            [y, jnp.zeros((y.shape[0], out_pad - hc), y.dtype)], axis=1)
    out_ref[...] = y


def gat_conv_pallas(x, w, att_src, att_dst, bias, neg_mask, *, heads, out_channels,
                    apply_elu=False, apply_log_softmax=False, row_tile=128):
    """One dense GATConv layer (all heads).

    neg_mask[i, j] = 0 where edge j -> i exists (incl. self loops), else -1e30 (bf16).
    x / neg_mask must already be row-padded so that N % row_tile == 0 (padded nodes
    have no edges).  Returns [N, round_up(heads*out_channels, 128)] f32: valid
    features in columns [:heads*out_channels], exact zeros in the padding columns."""
    n = x.shape[0]
    c = out_channels
    hc = heads * c
    hc_pad = _round_up(hc, _LANE)          # lane-dense width for h / W
    hp_lane = _round_up(heads, _LANE)      # alpha_dst lane padding (dense stores)
    hp_sub = _round_up(heads, _SUBLANE)    # alpha_src^T sublane padding
    out_pad = _round_up(hc, _LANE)
    row_tile = min(row_tile, n)
    assert n % row_tile == 0 and row_tile % 8 == 0, (n, row_tile)

    # Host side: fold per-head attention vectors into well-shaped projection
    # matrices so the kernel runs 2 matmuls instead of 2*heads M=1 ones; zero-pad
    # W / projections so every stage-1 store is lane-dense.
    w_pad = jnp.pad(w, ((0, 0), (0, hc_pad - hc))).astype(jnp.bfloat16)      # [Fin, HCpad]
    adst_proj = jnp.pad(_head_projection(att_dst, hp_lane),
                        ((0, hc_pad - hc), (0, 0))).astype(jnp.bfloat16)     # [HCpad, 128]
    asrct_proj = jnp.pad(_head_projection(att_src, hp_sub).T,
                         ((0, 0), (0, hc_pad - hc))).astype(jnp.bfloat16)    # [pad8(H), HCpad]

    vmem = lambda: pl.BlockSpec(memory_space=pltpu.MemorySpace.VMEM)
    vmem_limit = _vmem_limit_bytes()

    # Stage 1: projections (whole problem resident; x/h are small next to the mask).
    # TODO(synk): row-tile this stage too for graphs where x no longer fits in VMEM.
    h, a_dst, a_src_t = pl.pallas_call(
        _gat_proj_kernel,
        out_shape=(jax.ShapeDtypeStruct((n, hc_pad), jnp.bfloat16),
                   jax.ShapeDtypeStruct((n, hp_lane), jnp.float32),
                   jax.ShapeDtypeStruct((hp_sub, n), jnp.float32)),
        in_specs=[vmem(), vmem(), vmem(), vmem()],
        out_specs=(vmem(), vmem(), vmem()),
        compiler_params=pltpu.CompilerParams(vmem_limit_bytes=vmem_limit),
    )(x.astype(jnp.bfloat16), w_pad, asrct_proj, adst_proj)

    # Stage 2: masked attention + aggregation, row-tiled over target nodes.
    kernel = functools.partial(
        _gat_attn_kernel, heads=heads, out_channels=c, out_pad=out_pad,
        apply_elu=apply_elu, apply_log_softmax=apply_log_softmax)
    return pl.pallas_call(
        kernel,
        out_shape=jax.ShapeDtypeStruct((n, out_pad), jnp.float32),
        grid=(n // row_tile,),
        in_specs=[
            pl.BlockSpec((row_tile, hp_lane), lambda i: (i, 0)),   # alpha_dst row block
            pl.BlockSpec((hp_sub, n), lambda i: (0, 0)),           # alpha_src^T (resident)
            pl.BlockSpec((n, hc_pad), lambda i: (0, 0)),           # h (resident, bf16)
            pl.BlockSpec((1, hc), lambda i: (0, 0)),               # bias (resident)
            pl.BlockSpec((row_tile, n), lambda i: (i, 0)),         # mask row block (bf16)
        ],
        out_specs=pl.BlockSpec((row_tile, out_pad), lambda i: (i, 0)),
        compiler_params=pltpu.CompilerParams(
            dimension_semantics=("parallel",),
            vmem_limit_bytes=vmem_limit),
    )(a_dst, a_src_t, h, bias, neg_mask)


def gat_forward(x, adj, params, *, hidden_dim, output_dim, heads1=8, row_tile=128):
    n = x.shape[0]
    row_tile = min(row_tile, _round_up(n, 8))
    n_pad = _round_up(n, row_tile)
    if n_pad != n:   # padded nodes have no edges -> fully masked, sliced away below
        x = jnp.pad(x, ((0, n_pad - n), (0, 0)))
        adj = jnp.pad(adj, ((0, n_pad - n), (0, n_pad - n)))

    # Additive attention mask, built once and shared by both layers.
    neg_mask = jnp.where(adj > 0, 0.0, _NEG_BIG).astype(jnp.bfloat16)

    # conv1 + ELU fused in the attention kernel
    h1 = gat_conv_pallas(x, params["w1"], params["att_src1"], params["att_dst1"],
                         params["b1"], neg_mask, heads=heads1,
                         out_channels=hidden_dim, apply_elu=True, row_tile=row_tile)
    # TODO(synk): F.dropout(p=0.5) / GATConv attention dropout(p=0.6) are identity in eval mode.

    # h1 is lane-padded to a multiple of 128 with exact zeros; extend w2 with zero
    # rows so the padding flows through untouched (keeps conv2's input lane-dense).
    w2 = params["w2"]
    if h1.shape[1] != w2.shape[0]:
        w2 = jnp.pad(w2, ((0, h1.shape[1] - w2.shape[0]), (0, 0)))

    # conv2 + log_softmax(dim=1) fused in the attention kernel
    out = gat_conv_pallas(h1, w2, params["att_src2"], params["att_dst2"],
                          params["b2"], neg_mask, heads=1, out_channels=output_dim,
                          apply_log_softmax=True, row_tile=row_tile)
    return out[:n, :output_dim]


# ----------------------------- reference / setup -----------------------------

def gat_reference(x, adj, params, *, hidden_dim, output_dim, heads1=8):
    """Pure-JAX f32 dense GAT reference (same math, no bf16 casts)."""
    def conv(x, w, att_src, att_dst, bias, heads, c):
        h = x @ w
        outs = []
        for hd in range(heads):
            hh = h[:, hd * c:(hd + 1) * c]
            a_s = hh @ att_src[hd]
            a_d = hh @ att_dst[hd]
            e = a_d[:, None] + a_s[None, :]
            e = jnp.where(e > 0, e, 0.2 * e)
            e = jnp.where(adj > 0, e, _NEG_BIG)
            e = e - e.max(axis=1, keepdims=True)
            p = jnp.exp(e) * (adj > 0)
            outs.append((p / p.sum(axis=1, keepdims=True)) @ hh)
        return jnp.concatenate(outs, axis=1) + bias

    y = conv(x, params["w1"], params["att_src1"], params["att_dst1"],
             params["b1"], heads1, hidden_dim)
    y = jnp.where(y > 0, y, jnp.exp(y) - 1.0)
    y = conv(y, params["w2"], params["att_src2"], params["att_dst2"],
             params["b2"], 1, output_dim)
    return jax.nn.log_softmax(y, axis=1)


def glorot(key, shape):
    fan_in, fan_out = shape[0], shape[-1]
    limit = (6.0 / (fan_in + fan_out)) ** 0.5
    return jax.random.uniform(key, shape, jnp.float32, -limit, limit)


def init_gat_params(key, input_dim, hidden_dim, output_dim, heads1=8):
    ks = jax.random.split(key, 6)
    return {
        # conv1: GATConv(input_dim, hidden_dim, heads=8)
        "w1": glorot(ks[0], (input_dim, heads1 * hidden_dim)),
        "att_src1": glorot(ks[1], (heads1, hidden_dim)),
        "att_dst1": glorot(ks[2], (heads1, hidden_dim)),
        "b1": jnp.zeros((1, heads1 * hidden_dim), jnp.float32),
        # conv2: GATConv(hidden_dim * 8, output_dim, heads=1, concat=True)
        "w2": glorot(ks[3], (heads1 * hidden_dim, output_dim)),
        "att_src2": glorot(ks[4], (1, output_dim)),
        "att_dst2": glorot(ks[5], (1, output_dim)),
        "b2": jnp.zeros((1, output_dim), jnp.float32),
    }


def edge_index_to_dense_adj(edge_index, num_nodes):
    """adj[dst, src] = 1.0 for each edge, plus self loops (GATConv default)."""
    adj = jnp.zeros((num_nodes, num_nodes), jnp.float32)
    adj = adj.at[edge_index[1], edge_index[0]].set(1.0)
    return jnp.maximum(adj, jnp.eye(num_nodes, dtype=jnp.float32))


if __name__ == "__main__":
    N = 16            # number of graph nodes
    INPUT_DIM = 8
    HIDDEN_DIM = 8
    OUTPUT_DIM = 4
    HEADS = 8

    key = jax.random.PRNGKey(0)
    k_x, k_p = jax.random.split(key)

    # data.x : node features
    x = jax.random.normal(k_x, (N, INPUT_DIM), jnp.float32)

    # data.edge_index : bidirectional ring graph [2, 2N]
    src = jnp.arange(N)
    dst = (src + 1) % N
    edge_index = jnp.stack(
        [jnp.concatenate([src, dst]), jnp.concatenate([dst, src])], axis=0)
    adj = edge_index_to_dense_adj(edge_index, N)

    params = init_gat_params(k_p, INPUT_DIM, HIDDEN_DIM, OUTPUT_DIM, heads1=HEADS)

    # row_tile=8 -> 2 row tiles, exercising the pipelined grid even at toy N.
    out = gat_forward(x, adj, params, hidden_dim=HIDDEN_DIM,
                      output_dim=OUTPUT_DIM, heads1=HEADS, row_tile=8)
    out = jax.block_until_ready(out)

    assert out.shape == (N, OUTPUT_DIM), out.shape
    # rows of log_softmax should exp-sum to 1 (computed in f32 inside the kernel)
    assert jnp.allclose(jnp.sum(jnp.exp(out), axis=1), 1.0, atol=1e-3)

    # compare against a pure-JAX f32 reference (kernel uses bf16 MXU operands)
    ref = gat_reference(x, adj, params, hidden_dim=HIDDEN_DIM,
                        output_dim=OUTPUT_DIM, heads1=HEADS)
    max_err = float(jnp.max(jnp.abs(out - ref)))
    assert max_err < 0.1, max_err

    print("KERNEL_OK")
</pallas_src>

<mosaic_0001>
module attributes {stable_mosaic.version = 11 : i64} {
  func.func @_gat_proj_kernel(%arg0: memref<16x8xbf16, #tpu.memory_space<vmem>>, %arg1: memref<8x128xbf16, #tpu.memory_space<vmem>>, %arg2: memref<8x128xbf16, #tpu.memory_space<vmem>>, %arg3: memref<128x128xbf16, #tpu.memory_space<vmem>>, %arg4: memref<16x128xbf16, #tpu.memory_space<vmem>>, %arg5: memref<16x128xf32, #tpu.memory_space<vmem>>, %arg6: memref<8x16xf32, #tpu.memory_space<vmem>>) attributes {dimension_semantics = [], scalar_prefetch = 0 : i64, scratch_operands = 0 : i64, tpu.core_type = #tpu.core_type<tc>} {
    %c0 = arith.constant 0 : index
    %c0_0 = arith.constant 0 : index
    %0 = vector.load %arg0[%c0, %c0_0] : memref<16x8xbf16, #tpu.memory_space<vmem>>, vector<16x8xbf16>
    %c0_1 = arith.constant 0 : index
    %c0_2 = arith.constant 0 : index
    %1 = vector.load %arg1[%c0_1, %c0_2] : memref<8x128xbf16, #tpu.memory_space<vmem>>, vector<8x128xbf16>
    %cst = arith.constant dense<0.000000e+00> : vector<16x128xf32>
    %2 = tpu.matmul %0, %1, %cst {dimension_numbers = #tpu.dot_dimension_numbers<[1], [0], [0], [1], [0, 0, 1, 1], [], []>} : vector<16x8xbf16>, vector<8x128xbf16>, vector<16x128xf32> -> vector<16x128xf32>
    %3 = arith.truncf %2 : vector<16x128xf32> to vector<16x128xbf16>
    %c0_3 = arith.constant 0 : index
    %c0_4 = arith.constant 0 : index
    %4 = vector.load %arg4[%c0_3, %c0_4] : memref<16x128xbf16, #tpu.memory_space<vmem>>, vector<16x128xbf16>
    tpu.vector_store %arg4[%c0_3, %c0_4], %3 {strides = array<i32>} : memref<16x128xbf16, #tpu.memory_space<vmem>>, vector<16x128xbf16>,
    %c0_5 = arith.constant 0 : index
    %c0_6 = arith.constant 0 : index
    %5 = vector.load %arg3[%c0_5, %c0_6] : memref<128x128xbf16, #tpu.memory_space<vmem>>, vector<128x128xbf16>
    %cst_7 = arith.constant dense<0.000000e+00> : vector<16x128xf32>
    %6 = tpu.matmul %3, %5, %cst_7 {dimension_numbers = #tpu.dot_dimension_numbers<[1], [0], [0], [1], [0, 0, 1, 1], [], []>} : vector<16x128xbf16>, vector<128x128xbf16>, vector<16x128xf32> -> vector<16x128xf32>
    %c0_8 = arith.constant 0 : index
    %c0_9 = arith.constant 0 : index
    %7 = vector.load %arg5[%c0_8, %c0_9] : memref<16x128xf32, #tpu.memory_space<vmem>>, vector<16x128xf32>
    tpu.vector_store %arg5[%c0_8, %c0_9], %6 {strides = array<i32>} : memref<16x128xf32, #tpu.memory_space<vmem>>, vector<16x128xf32>,
    %c0_10 = arith.constant 0 : index
    %c0_11 = arith.constant 0 : index
    %8 = vector.load %arg2[%c0_10, %c0_11] : memref<8x128xbf16, #tpu.memory_space<vmem>>, vector<8x128xbf16>
    %cst_12 = arith.constant dense<0.000000e+00> : vector<8x16xf32>
    %9 = tpu.matmul %8, %3, %cst_12 {dimension_numbers = #tpu.dot_dimension_numbers<[1], [1], [0], [0], [0, 0, 1, 0], [], []>} : vector<8x128xbf16>, vector<16x128xbf16>, vector<8x16xf32> -> vector<8x16xf32>
    %c0_13 = arith.constant 0 : index
    %c0_14 = arith.constant 0 : index
    %10 = vector.load %arg6[%c0_13, %c0_14] : memref<8x16xf32, #tpu.memory_space<vmem>>, vector<8x16xf32>
    tpu.vector_store %arg6[%c0_13, %c0_14], %9 {strides = array<i32>} : memref<8x16xf32, #tpu.memory_space<vmem>>, vector<8x16xf32>,
    return
  }
}

</mosaic_0001>

<bundles_post_ra>
// kernel: tpu_custom_call.1
= control target key start
LH: loop header
LB: loop body
LE: loop exit
PB: predicated region body
PF: predicated region fallthrough
CT: control target
= control target key end

     0   :  { %12 = vsyncpa [#allocation3], 0  ;;  %s588_s0 = inlined_call_operand.vmem [shape: bf16[16,8], index: 0, kind: input, shape index: {}]   ;;  %s589_s1 = inlined_call_operand.vmem [shape: bf16[8,128], index: 1, kind: input, shape index: {}]   ;;  %s590_s2 = inlined_call_operand.vmem [shape: bf16[8,128], index: 2, kind: input, shape index: {}]   ;;  %s591_s3 = inlined_call_operand.hbm [shape: bf16[128,128], index: 3, kind: input, shape index: {}]   ;;  %s592_s4 = inlined_call_operand.hbm [shape: bf16[16,128], index: 4, kind: output, shape index: {0}]   ;;  %s593_s5 = inlined_call_operand.hbm [shape: f32[16,128], index: 5, kind: output, shape index: {1}]   ;;  %s594_s6 = inlined_call_operand.hbm [shape: f32[8,16], index: 6, kind: output, shape index: {2}]  }
   0x1   :  { %13 = vsyncpa [#allocation4], 0 }
   0x2   :  { %14 = vsyncpa [#allocation7], 0  ;;  %s477_s21 = smov [#allocation2]   ;;  %s383_s25 = scalar_lea.hbm %s591_s3, 1024 }
   0x3   :  { %s26_s22 = sshll.u32 %s477_s21, 4  ;;  %p384_p0 = scmp.ne.s32.totalorder %s591_s3, %s383_s25  ;;  %s27_s22 = int_to_ptr.vmem [resolvable:$true] %s26_s22 }
   0x4   :  { %p387_p1 = scmp.lt.u32.totalorder %s383_s25, %s591_s3 }
   0x6   :  { %p389_p2 = pnand %p387_p1, %p384_p0 }
   0x8   :  { %392 = shalt.err (!%p389_p2)
}
   0x9   :  { %s393_s30 = scalar_lea.vmem %s27_s22, 1024  ;;  %p398_p4 = scmp.lt.s32.totalorder %s27_s22, %s27_s22 }
   0xa   :  { %p394_p3 = scmp.ne.s32.totalorder %s27_s22, %s393_s30  ;;  %p399_p5 = scmp.lt.s32.totalorder %s393_s30, %s393_s30 }
   0xc   :  { %p400_p6 = por %p399_p5, %p398_p4 }
   0xe   :  { %p401_p7 = pnand %p400_p6, %p394_p3 }
  0x10   :  { %404 = shalt.err (!%p401_p7)
}
  0x11   :  { %s478_s7 = smov 64   ;;  %s479_s8 = smov 4  }
  0x12   :  { %32 = dma.hbm_to_vmem [thread:$0]  %s591_s3, 1024, %s27_s22, [#allocation3], %s478_s7, %s478_s7, %s479_s8  }
  0x13   :  { %471 = dma.done.wait [#allocation3], 1024  }
  0x14   :  { %472 = vsyncadd [#allocation3], 4294966272  ;;  %v480_v0 = vmov 0.0   ;;  %vm481_vm0 = vmmov 0   ;;  %vm49_vm1 = vcmask 1043456   ;;  %v374_v3 = vld [vmem:[%s588_s0] sm:$0xff]  }
  0x15   :  { %332 = vmatprep.subr.bf16.mxu0 %v480_v0  ;;  %334 = vmatprep.mubr.msk.bf16.mxu0 %vm481_vm0, %v480_v0  ;;  %v39_v1 = vld [vmem:[%s589_s1] sm:$0xf]  ;;  %vm45_vm2 = vcmask 64512   ;;  %v375_v4 = vld [vmem:[#allocation2] sm:$0xff]   ;;  %v376_v5 = vld [vmem:[#allocation2 + $0x8] sm:$0xff]   ;;  %s482_s3 = smov [#allocation5]  }
  0x16   :  { %338 = vmatprep.subr.bf16.mxu1 %v480_v0  ;;  %354 = vmatprep.mubr.msk.bf16.mxu1 %vm481_vm0, %v480_v0  ;;  %v51_v2 = vsel %vm49_vm1, %v39_v1, 0  ;;  %v377_v6 = vld [vmem:[#allocation2 + $0x10] sm:$0xff]   ;;  %v378_v7 = vld [vmem:[#allocation2 + $0x18] sm:$0xff]   ;;  %v379_v8 = vld [vmem:[#allocation2 + $0x20] sm:$0xff]   ;;  %s259_s15 = sshll.u32 %s482_s3, 4  ;;  %s260_s15 = int_to_ptr.vmem [resolvable:$true] %s259_s15 }
  0x17   :  { %333 = vmatpush3.bf16.msra.mxu0 %v51_v2  ;;  %339 = vmatpush3.bf16.msra.mxu1 %v375_v4  ;;  %v380_v9 = vld [vmem:[#allocation2 + $0x28] sm:$0xff]   ;;  %v381_v10 = vld [vmem:[#allocation2 + $0x30] sm:$0xff]   ;;  %v382_v11 = vld [vmem:[#allocation2 + $0x38] sm:$0xff]   ;;  %s405_s16 = scalar_lea.vmem %s260_s15, 128  ;;  %p410_p9 = scmp.lt.s32.totalorder %s260_s15, %s260_s15 }
  0x18   :  { %358 = vmatprep.subr.bf16.mxu0 %v480_v0  ;;  %340 = vmatprep.subr.bf16.mxu1 %v480_v0  ;;  %v211_v17 = vld [vmem:[%s590_s2] sm:$0xf]  ;;  %p406_p8 = scmp.ne.s32.totalorder %s260_s15, %s405_s16  ;;  %p411_p10 = scmp.lt.s32.totalorder %s405_s16, %s405_s16 }
  0x1a   :  { %335 = vmatmul.mubr.msk.bf16.vlgmr.msra.gmra.mrb[0].mxu0 %vm45_vm2, %v374_v3  ;;  %p412_p11 = por %p411_p10, %p410_p9 }
  0x1b   :  { %360 = vmatprep.mubr.msk.bf16.mxu0 %vm481_vm0, %v480_v0  ;;  %341 = vmatpush3.bf16.msra.mxu1 %v376_v5 }
  0x1c   :  { %342 = vmatprep.subr.bf16.mxu1 %v480_v0  ;;  %p413_p12 = pnand %p412_p11, %p406_p8 }
  0x1f   :  { %343 = vmatpush3.bf16.msra.mxu1 %v377_v6 }
  0x20   :  { %344 = vmatprep.subr.bf16.mxu1 %v480_v0 }
  0x23   :  { %345 = vmatpush3.bf16.msra.mxu1 %v378_v7 }
  0x24   :  { %346 = vmatprep.subr.bf16.mxu1 %v480_v0 }
  0x27   :  { %347 = vmatpush3.bf16.msra.mxu1 %v379_v8 }
  0x28   :  { %348 = vmatprep.subr.bf16.mxu1 %v480_v0 }
  0x2b   :  { %349 = vmatpush3.bf16.msra.mxu1 %v380_v9 }
  0x2c   :  { %350 = vmatprep.subr.bf16.mxu1 %v480_v0 }
  0x2f   :  { %351 = vmatpush3.bf16.msra.mxu1 %v381_v10 }
  0x30   :  { %352 = vmatprep.subr.bf16.mxu1 %v480_v0 }
  0x33   :  { %353 = vmatpush3.bf16.msra.mxu1 %v382_v11 }
  0xed   :  { %v87_v12 = vpop.f32.mrb[0].mxu0 }
  0xee   :  { %v336_v13 = vpop.f32.mrb[1].mxu0 }
  0xef   :  { %v90_v14 = vpop.f32.mrb[2].mxu0 }
  0xf0   :  { %v94_v15 = vpack.c.bf16 %v90_v14, %v87_v12  ;;  %v337_v16 = vpop.f32.mrb[3].mxu0 }
  0xf2   :  { %318 = vst [vmem:[#allocation5] sm:$0xff] %v94_v15   ;;  %355 = vmatmul.mubr.bf16.vlgmr.msra.gmra.mrb[0].mxu1 %v94_v15  ;;  %359 = vmatpush3.bf16.xpose.msra.mxu0 %v94_v15 }
  0xf9   :  { %361 = vmatmul.mubr.bf16.vlgmr.msra.gmra.mrb[4].mxu0 %v211_v17 }
  0xfa   :  { %416 = shalt.err (!%p413_p12)
}
  0xfb   :  { %s417_s19 = scalar_lea.hbm %s592_s4, 128 }
  0xfc   :  { %p418_p13 = scmp.ne.s32.totalorder %s592_s4, %s417_s19  ;;  %p421_p0 = scmp.lt.u32.totalorder %s417_s19, %s592_s4 }
  0xfe   :  { %p423_p1 = pnand %p421_p0, %p418_p13 }
 0x100   :  { %426 = shalt.err (!%p423_p1)
}
 0x101   :  { %265 = dma.vmem_to_hbm [thread:$0]  %s260_s15, 128, %s592_s4, [#allocation4], %s478_s7, %s478_s7, %s479_s8  }
 0x102   :  { %s483_s25 = smov [#allocation6]   ;;  %s484_s27 = smov [#allocation8]  }
 0x103   :  { %s271_s26 = sshll.u32 %s483_s25, 4  ;;  %s284_s28 = sshll.u32 %s484_s27, 4  ;;  %s272_s26 = int_to_ptr.vmem [resolvable:$true] %s271_s26  ;;  %s285_s28 = int_to_ptr.vmem [resolvable:$true] %s284_s28 }
 0x104   :  { %s427_s29 = scalar_lea.vmem %s272_s26, 256  ;;  %p432_p3 = scmp.lt.s32.totalorder %s272_s26, %s272_s26 }
 0x105   :  { %p428_p2 = scmp.ne.s32.totalorder %s272_s26, %s427_s29  ;;  %p433_p4 = scmp.lt.s32.totalorder %s427_s29, %s427_s29 }
 0x107   :  { %p434_p5 = por %p433_p4, %p432_p3 }
 0x109   :  { %p435_p6 = pnand %p434_p5, %p428_p2 }
 0x1c5   :  { %v202_v18 = vpop.f32.mrb[0].mxu1 }
 0x1c6   :  { %209 = vst [vmem:[#allocation6] sm:$0xff] %v202_v18  ;;  %v356_v19 = vpop.f32.mrb[1].mxu1 }
 0x1c7   :  { %v205_v20 = vpop.f32.mrb[2].mxu1 }
 0x1c8   :  { %210 = vst [vmem:[#allocation6 + $0x8] sm:$0xff] %v205_v20  ;;  %v357_v21 = vpop.f32.mrb[3].mxu1 }
 0x1c9   :  { %438 = shalt.err (!%p435_p6)
}
 0x1ca   :  { %s439_s7 = scalar_lea.hbm %s593_s5, 256 }
 0x1cb   :  { %p440_p7 = scmp.ne.s32.totalorder %s593_s5, %s439_s7  ;;  %p443_p8 = scmp.lt.u32.totalorder %s439_s7, %s593_s5 }
 0x1cd   :  { %p445_p9 = pnand %p443_p8, %p440_p7 }
 0x1cf   :  { %448 = shalt.err (!%p445_p9)
}
 0x1d0   :  { %s485_s12 = smov 128   ;;  %s486_s13 = smov 8   ;;  %vm252_vm3 = vcmask 130048   ;;  %v246_v22 = vpop.f32.mrb[4].mxu0 }
 0x1d1   :  { %277 = dma.vmem_to_hbm [thread:$0]  %s272_s26, 256, %s593_s5, [#allocation7], %s485_s12, %s485_s12, %s486_s13   ;;  %253 = vst.msk [vmem:[#allocation8] sm:$0xff] %vm252_vm3, %v246_v22  ;;  %v362_v23 = vpop.f32.mrb[5].mxu0 }
 0x1d2   :  { %v249_v24 = vpop.f32.mrb[6].mxu0  ;;  %s449_s1 = scalar_lea.vmem %s285_s28, 128  ;;  %p454_p11 = scmp.lt.s32.totalorder %s285_s28, %s285_s28 }
 0x1d3   :  { %p450_p10 = scmp.ne.s32.totalorder %s285_s28, %s449_s1  ;;  %p455_p12 = scmp.lt.s32.totalorder %s449_s1, %s449_s1 }
 0x1d5   :  { %p456_p13 = por %p455_p12, %p454_p11 }
 0x1d7   :  { %p457_p0 = pnand %p456_p13, %p450_p10 }
 0x1d9   :  { %460 = shalt.err (!%p457_p0)
}
 0x1da   :  { %s461_s16 = scalar_lea.hbm %s594_s6, 128 }
 0x1db   :  { %p462_p1 = scmp.ne.s32.totalorder %s594_s6, %s461_s16  ;;  %p465_p2 = scmp.lt.u32.totalorder %s461_s16, %s594_s6 }
 0x1dd   :  { %p467_p3 = pnand %p465_p2, %p462_p1 }
 0x1df   :  { %470 = shalt.err (!%p467_p3)
}
 0x1e0   :  { %287 = dma.vmem_to_hbm [thread:$0]  %s285_s28, 128, %s594_s6, [#allocation7]   ;;  %v363_v25 = vpop.f32.mrb[7].mxu0 }
 0x1e1   :  { %473 = dma.done.wait [#allocation4], 128  }
 0x1e2   :  { %474 = vsyncadd [#allocation4], 4294967168 }
 0x1e3   :  { %475 = dma.done.wait [#allocation7], 384  }
 0x1e4   :  { %476 = vsyncadd [#allocation7], 4294966912 }
 0x1e5   :  { %297 = vsyncpa [#allocation3], 1 }
 0x1e6   :  { %298 = vsyncpa [#allocation4], 1 }
 0x1e7   :  { %299 = vsyncpa [#allocation7], 1 }

</bundles_post_ra>
